<compile_context>
chip_gen: v7x
topology: tpu7x:2x2x1
jax: 0.10.0
libtpu: 0.0.40
codegen_flags: <defaults>
</compile_context>

<pallas_src>
import functools

import jax
import jax.numpy as jnp
from jax import lax
from jax.experimental import pallas as pl
from jax.experimental.pallas import tpu as pltpu


def _round_up(x: int, m: int) -> int:
    return ((x + m - 1) // m) * m


def _vmem_needed(t_r: int, t_c: int, d: int, itemsize: int) -> int:
    return (4 * t_r * d * itemsize      # f1 (double-buffered) + scaled scratch + temp
            + 2 * t_c * d * itemsize    # streamed f2 column tile, double-buffered
            + 2 * 8 * 128 * 4           # output block
            + 3 * t_r * 4               # m / l / pos scratch
            + 4 * t_r * t_c * 4)        # s / p / select temporaries (generous)


def _ntxent_kernel(f1_ref, f2_ref, out_ref, f1s_scr, m_scr, l_scr, pos_scr, *,
                   inv_tau: float, batch: int, last_col_valid, mask_rows: bool):
    # f1_ref : [t_r, d]  row tile of f1 (block index (i, 0), resident over k)
    # f2_ref : [t_c, d]  column tile of f2 (streamed, block index (k, 0))
    # out_ref: [8, 128]  per-row-tile partial loss sum, lane-dense broadcast
    # f1s_scr: [t_r, d]  f1 row tile pre-scaled by 1/tau (feeds the MXU)
    # m/l/pos: [t_r, 1]  running row max / running sum-exp / positive logit
    t_r = f1_ref.shape[0]
    t_c = f2_ref.shape[0]
    ratio = t_r // t_c                      # t_r is a multiple of t_c (static)
    i = pl.program_id(0)
    k = pl.program_id(1)
    nk = pl.num_programs(1)

    @pl.when(k == 0)
    def _init():
        # Hoist 1/tau onto the row tile once per row tile (kills a full
        # [t_r, t_c] VALU pass per inner step).  Stays in the input dtype so
        # the MXU runs at native rate for bf16.
        f1s_scr[...] = f1_ref[...] * inv_tau
        m_scr[...] = jnp.full(m_scr.shape, -jnp.inf, dtype=m_scr.dtype)
        l_scr[...] = jnp.zeros(l_scr.shape, dtype=l_scr.dtype)
        pos_scr[...] = jnp.zeros(pos_scr.shape, dtype=pos_scr.dtype)

    # Similarity tile (already scaled by 1/tau through f1), MXU, f32
    # accumulation, transpose-free (contract the feature dim of both operands).
    s = lax.dot_general(
        f1s_scr[...], f2_ref[...],
        dimension_numbers=(((1,), (1,)), ((), ())),
        preferred_element_type=jnp.float32)

    # Positive logit sim[r, r]/tau: read it off the diagonal of s, only on the
    # column tiles that intersect this row tile's diagonal.
    @pl.when((k >= i * ratio) & (k < (i + 1) * ratio))
    def _extract_pos():
        row_ids = lax.broadcasted_iota(jnp.int32, s.shape, 0)
        col_ids = lax.broadcasted_iota(jnp.int32, s.shape, 1)
        target = row_ids + (i * t_r - k * t_c)      # local column of the diagonal
        pos_scr[...] += jnp.sum(jnp.where(col_ids == target, s, 0.0),
                                axis=-1, keepdims=True)

    def _online_update(s_tile):
        m_prev = m_scr[...]
        m_new = jnp.maximum(m_prev, jnp.max(s_tile, axis=-1, keepdims=True))
        alpha = jnp.exp(m_prev - m_new)
        p = jnp.exp(s_tile - m_new)
        l_scr[...] = alpha * l_scr[...] + jnp.sum(p, axis=-1, keepdims=True)
        m_scr[...] = m_new

    if last_col_valid is None:
        # No column padding anywhere: plain online LSE update, no masking cost.
        _online_update(s)
    else:
        # Only the last column tile can contain padding (b_pad_c - b < t_c).
        @pl.when(k != nk - 1)
        def _unmasked():
            _online_update(s)

        @pl.when(k == nk - 1)
        def _masked():
            col_ids = lax.broadcasted_iota(jnp.int32, (1, t_c), 1)
            valid = col_ids < last_col_valid        # static constant mask row
            _online_update(jnp.where(valid, s, -jnp.inf))

    @pl.when(k == nk - 1)
    def _finalize():
        lse = m_scr[...] + jnp.log(l_scr[...])
        per_row = lse - pos_scr[...]                # [t_r, 1]
        if mask_rows:
            rows = lax.broadcasted_iota(jnp.int32, per_row.shape, 0) + i * t_r
            per_row = jnp.where(rows < batch, per_row, 0.0)
        partial = jnp.sum(per_row, keepdims=True)   # [1, 1]
        out_ref[...] = jnp.broadcast_to(partial, out_ref.shape)


def ntxent_loss(f1: jax.Array, f2: jax.Array, tau: float = 0.2) -> jax.Array:
    """Matches NTXentLoss.forward: F.cross_entropy(f1 @ f2.T / tau, arange(B))."""
    assert f1.ndim == 2 and f1.shape == f2.shape
    b, d = f1.shape
    itemsize = jnp.dtype(f1.dtype).itemsize

    # Per-TensorCore VMEM budget: ~54 MiB on v7x (64 MiB VMEM), ~108 MiB on
    # v5e / v6e (128 MiB).  Fallback is the v7x-safe value.
    try:
        vmem_cap = int(pltpu.get_tpu_info().vmem_capacity_bytes)
    except Exception:
        vmem_cap = 64 * 1024 * 1024
    vmem_budget = int(vmem_cap * 0.85)

    # Column tile: MXU-native width.  128 when d is small (softmax epilogue /
    # VPU dominates; keeps the f32 s/p intermediates out of spill territory),
    # 256 when d is large enough to be MXU-bound.
    t_c = 256 if d >= 512 else 128
    t_c = min(t_c, _round_up(b, 8))

    # Row tile: as large as VMEM allows (bigger t_r => fewer passes over f2 =>
    # less HBM traffic), capped by the padded batch and a per-generation max,
    # shrunk (not clamped) if the tiles would not fit the budget.
    row_cap = _round_up(b, t_c)
    max_tr = 2048 if vmem_cap >= (100 << 20) else 1024
    t_r = min(row_cap, max(t_c, (max_tr // t_c) * t_c))
    while t_r > t_c and _vmem_needed(t_r, t_c, d, itemsize) > vmem_budget:
        t_r = max(t_c, ((t_r // 2) // t_c) * t_c)
    # TODO(synk): for very large d the whole-d blocks can still exceed VMEM even
    # at t_r == t_c; a K(d)-tiled inner loop would be needed there.

    b_pad_r = _round_up(b, t_r)
    b_pad_c = _round_up(b, t_c)
    f1p = jnp.pad(f1, ((0, b_pad_r - b), (0, 0))) if b_pad_r != b else f1
    f2p = jnp.pad(f2, ((0, b_pad_c - b), (0, 0))) if b_pad_c != b else f2

    g_r = b_pad_r // t_r
    g_c = b_pad_c // t_c
    last_col_valid = None if b_pad_c == b else (b - (g_c - 1) * t_c)
    mask_rows = b_pad_r != b

    kernel = functools.partial(
        _ntxent_kernel, inv_tau=1.0 / float(tau), batch=b,
        last_col_valid=last_col_valid, mask_rows=mask_rows)

    grid_spec = pltpu.PrefetchScalarGridSpec(
        num_scalar_prefetch=0,
        grid=(g_r, g_c),            # (row tiles "parallel", column tiles "arbitrary")
        in_specs=[
            pl.BlockSpec((t_r, d), lambda i, k: (i, 0)),   # f1 row tile (resident over k)
            pl.BlockSpec((t_c, d), lambda i, k: (k, 0)),   # f2 column tile (streamed)
        ],
        out_specs=pl.BlockSpec((8, 128), lambda i, k: (i, 0)),
        scratch_shapes=[
            pltpu.VMEM((t_r, d), f1.dtype),     # f1 * (1/tau), reused across k
            pltpu.VMEM((t_r, 1), jnp.float32),  # running row max
            pltpu.VMEM((t_r, 1), jnp.float32),  # running sum of exp
            pltpu.VMEM((t_r, 1), jnp.float32),  # positive logit
        ],
    )

    partials = pl.pallas_call(
        kernel,
        out_shape=jax.ShapeDtypeStruct((g_r * 8, 128), jnp.float32),
        grid_spec=grid_spec,
        compiler_params=pltpu.CompilerParams(
            dimension_semantics=("parallel", "arbitrary"),
            vmem_limit_bytes=vmem_budget,
        ),
    )(f1p, f2p)

    # Each row tile wrote its (row-masked) partial loss sum broadcast over one
    # (8, 128) block; reduce the g_r scalars and take the batch mean
    # (cross_entropy default reduction).
    return jnp.sum(partials[::8, 0]) / jnp.float32(b)


def _reference_ntxent(f1, f2, tau):
    """Pure-JAX reference mirroring the PyTorch forward (for verification)."""
    logits = jnp.matmul(f1, f2.T, precision=lax.Precision.HIGHEST) / tau
    logprobs = jax.nn.log_softmax(logits, axis=-1)
    idx = jnp.arange(f1.shape[0])
    return -jnp.mean(logprobs[idx, idx])


if __name__ == "__main__":
    key = jax.random.PRNGKey(0)
    tau = 0.2
    k1, k2, k3, k4 = jax.random.split(key, 4)

    # Case 1: small single-tile case (batch=8, hidden=32).
    f1 = jax.random.normal(k1, (8, 32), dtype=jnp.float32)
    f2 = jax.random.normal(k2, (8, 32), dtype=jnp.float32)
    loss = ntxent_loss(f1, f2, tau)
    jax.block_until_ready(loss)
    ref = _reference_ntxent(f1, f2, tau)
    # Tolerance allows for MXU multi-pass f32 matmul vs. XLA HIGHEST-precision matmul.
    assert jnp.allclose(loss, ref, rtol=2e-2, atol=2e-2), (loss, ref)

    # Case 2: multi-column-tile grid with row/column padding (exercises the
    # online LSE, diagonal positive extraction, and both masking paths).
    g1 = jax.random.normal(k3, (300, 32), dtype=jnp.float32)
    g2 = jax.random.normal(k4, (300, 32), dtype=jnp.float32)
    loss2 = ntxent_loss(g1, g2, tau)
    jax.block_until_ready(loss2)
    ref2 = _reference_ntxent(g1, g2, tau)
    assert jnp.allclose(loss2, ref2, rtol=2e-2, atol=2e-2), (loss2, ref2)

    print("KERNEL_OK")
</pallas_src>

<mosaic_0001>
module attributes {stable_mosaic.version = 11 : i64} {
  func.func @_ntxent_kernel(%arg0: i32, %arg1: i32, %arg2: memref<8x32xf32, #tpu.memory_space<vmem>>, %arg3: memref<8x32xf32, #tpu.memory_space<vmem>>, %arg4: memref<8x128xf32, #tpu.memory_space<vmem>>, %arg5: memref<8x32xf32, #tpu.memory_space<vmem>>, %arg6: memref<8x1xf32, #tpu.memory_space<vmem>>, %arg7: memref<8x1xf32, #tpu.memory_space<vmem>>, %arg8: memref<8x1xf32, #tpu.memory_space<vmem>>) attributes {dimension_semantics = [#tpu.dimension_semantics<parallel>, #tpu.dimension_semantics<arbitrary>], iteration_bounds = array<i64: 1, 1>, scalar_prefetch = 0 : i64, scratch_operands = 4 : i64, tpu.core_type = #tpu.core_type<tc>, window_params = [{transform_indices = @transform_0, window_bounds = array<i64: 8, 32>}, {transform_indices = @transform_1, window_bounds = array<i64: 8, 32>}, {transform_indices = @transform_2, window_bounds = array<i64: 8, 128>}]} {
    %c0_i32 = arith.constant 0 : i32
    %0 = arith.cmpi eq, %arg1, %c0_i32 : i32
    %1 = arith.extui %0 : i1 to i32
    %c0_i32_0 = arith.constant 0 : i32
    %2 = arith.cmpi ne, %1, %c0_i32_0 : i32
    scf.if %2 {
      %c0_19 = arith.constant 0 : index
      %c0_20 = arith.constant 0 : index
      %33 = vector.load %arg2[%c0_19, %c0_20] : memref<8x32xf32, #tpu.memory_space<vmem>>, vector<8x32xf32>
      %cst_21 = arith.constant 5.000000e+00 : f32
      %34 = vector.broadcast %cst_21 : f32 to vector<8x32xf32>
      %35 = arith.mulf %33, %34 : vector<8x32xf32>
      %c0_22 = arith.constant 0 : index
      %c0_23 = arith.constant 0 : index
      %36 = vector.load %arg5[%c0_22, %c0_23] : memref<8x32xf32, #tpu.memory_space<vmem>>, vector<8x32xf32>
      tpu.vector_store %arg5[%c0_22, %c0_23], %35 {strides = array<i32>} : memref<8x32xf32, #tpu.memory_space<vmem>>, vector<8x32xf32>,
      %cst_24 = arith.constant 0xFF800000 : f32
      %37 = vector.broadcast %cst_24 : f32 to vector<8x1xf32>
      %c0_25 = arith.constant 0 : index
      %c0_26 = arith.constant 0 : index
      %38 = vector.load %arg6[%c0_25, %c0_26] : memref<8x1xf32, #tpu.memory_space<vmem>>, vector<8x1xf32>
      tpu.vector_store %arg6[%c0_25, %c0_26], %37 {strides = array<i32>} : memref<8x1xf32, #tpu.memory_space<vmem>>, vector<8x1xf32>,
      %cst_27 = arith.constant 0.000000e+00 : f32
      %39 = vector.broadcast %cst_27 : f32 to vector<8x1xf32>
      %c0_28 = arith.constant 0 : index
      %c0_29 = arith.constant 0 : index
      %40 = vector.load %arg7[%c0_28, %c0_29] : memref<8x1xf32, #tpu.memory_space<vmem>>, vector<8x1xf32>
      tpu.vector_store %arg7[%c0_28, %c0_29], %39 {strides = array<i32>} : memref<8x1xf32, #tpu.memory_space<vmem>>, vector<8x1xf32>,
      %cst_30 = arith.constant 0.000000e+00 : f32
      %41 = vector.broadcast %cst_30 : f32 to vector<8x1xf32>
      %c0_31 = arith.constant 0 : index
      %c0_32 = arith.constant 0 : index
      %42 = vector.load %arg8[%c0_31, %c0_32] : memref<8x1xf32, #tpu.memory_space<vmem>>, vector<8x1xf32>
      tpu.vector_store %arg8[%c0_31, %c0_32], %41 {strides = array<i32>} : memref<8x1xf32, #tpu.memory_space<vmem>>, vector<8x1xf32>,
    } else {
    }
    %c0 = arith.constant 0 : index
    %c0_1 = arith.constant 0 : index
    %3 = vector.load %arg5[%c0, %c0_1] : memref<8x32xf32, #tpu.memory_space<vmem>>, vector<8x32xf32>
    %c0_2 = arith.constant 0 : index
    %c0_3 = arith.constant 0 : index
    %4 = vector.load %arg3[%c0_2, %c0_3] : memref<8x32xf32, #tpu.memory_space<vmem>>, vector<8x32xf32>
    %cst = arith.constant dense<0.000000e+00> : vector<8x8xf32>
    %5 = tpu.matmul %3, %4, %cst {dimension_numbers = #tpu.dot_dimension_numbers<[1], [1], [0], [0], [0, 0, 1, 0], [], []>} : vector<8x32xf32>, vector<8x32xf32>, vector<8x8xf32> -> vector<8x8xf32>
    %c1_i32 = arith.constant 1 : i32
    %6 = arith.muli %arg0, %c1_i32 : i32
    %7 = arith.cmpi sge, %arg1, %6 : i32
    %c1_i32_4 = arith.constant 1 : i32
    %8 = arith.addi %arg0, %c1_i32_4 : i32
    %c1_i32_5 = arith.constant 1 : i32
    %9 = arith.muli %8, %c1_i32_5 : i32
    %10 = arith.cmpi slt, %arg1, %9 : i32
    %11 = arith.andi %7, %10 : i1
    %12 = arith.extui %11 : i1 to i32
    %c0_i32_6 = arith.constant 0 : i32
    %13 = arith.cmpi ne, %12, %c0_i32_6 : i32
    scf.if %13 {
      %33 = tpu.iota {dimensions = array<i32: 0>} : vector<8x8xi32>
      %34 = tpu.iota {dimensions = array<i32: 1>} : vector<8x8xi32>
      %c8_i32 = arith.constant 8 : i32
      %35 = arith.muli %arg0, %c8_i32 : i32
      %c8_i32_19 = arith.constant 8 : i32
      %36 = arith.muli %arg1, %c8_i32_19 : i32
      %37 = arith.subi %35, %36 : i32
      %38 = vector.broadcast %37 : i32 to vector<8x8xi32>
      %39 = arith.addi %33, %38 : vector<8x8xi32>
      %c0_20 = arith.constant 0 : index
      %c0_21 = arith.constant 0 : index
      %40 = vector.load %arg8[%c0_20, %c0_21] : memref<8x1xf32, #tpu.memory_space<vmem>>, vector<8x1xf32>
      %41 = arith.cmpi eq, %34, %39 : vector<8x8xi32>
      %cst_22 = arith.constant 0.000000e+00 : f32
      %42 = vector.broadcast %cst_22 : f32 to vector<8x8xf32>
      %43 = arith.select %41, %5, %42 : vector<8x8xi1>, vector<8x8xf32>
      %cst_23 = arith.constant dense<0.000000e+00> : vector<8xf32>
      %44 = vector.multi_reduction <add>, %43, %cst_23 [1] : vector<8x8xf32> to vector<8xf32>
      %45 = vector.shape_cast %44 : vector<8xf32> to vector<8x1xf32>
      %46 = arith.addf %40, %45 : vector<8x1xf32>
      %c0_24 = arith.constant 0 : index
      %c0_25 = arith.constant 0 : index
      %47 = vector.load %arg8[%c0_24, %c0_25] : memref<8x1xf32, #tpu.memory_space<vmem>>, vector<8x1xf32>
      tpu.vector_store %arg8[%c0_24, %c0_25], %46 {strides = array<i32>} : memref<8x1xf32, #tpu.memory_space<vmem>>, vector<8x1xf32>,
    } else {
    }
    %c0_7 = arith.constant 0 : index
    %c0_8 = arith.constant 0 : index
    %14 = vector.load %arg6[%c0_7, %c0_8] : memref<8x1xf32, #tpu.memory_space<vmem>>, vector<8x1xf32>
    %cst_9 = arith.constant dense<0xFF800000> : vector<8xf32>
    %15 = vector.multi_reduction <maximumf>, %5, %cst_9 [1] : vector<8x8xf32> to vector<8xf32>
    %16 = vector.shape_cast %15 : vector<8xf32> to vector<8x1xf32>
    %17 = arith.maximumf %14, %16 : vector<8x1xf32>
    %18 = arith.subf %14, %17 : vector<8x1xf32>
    %19 = math.exp %18 : vector<8x1xf32>
    %20 = vector.broadcast %17 : vector<8x1xf32> to vector<8x8xf32>
    %21 = arith.subf %5, %20 : vector<8x8xf32>
    %22 = math.exp %21 : vector<8x8xf32>
    %c0_10 = arith.constant 0 : index
    %c0_11 = arith.constant 0 : index
    %23 = vector.load %arg7[%c0_10, %c0_11] : memref<8x1xf32, #tpu.memory_space<vmem>>, vector<8x1xf32>
    %24 = arith.mulf %19, %23 : vector<8x1xf32>
    %cst_12 = arith.constant dense<0.000000e+00> : vector<8xf32>
    %25 = vector.multi_reduction <add>, %22, %cst_12 [1] : vector<8x8xf32> to vector<8xf32>
    %26 = vector.shape_cast %25 : vector<8xf32> to vector<8x1xf32>
    %27 = arith.addf %24, %26 : vector<8x1xf32>
    %c0_13 = arith.constant 0 : index
    %c0_14 = arith.constant 0 : index
    %28 = vector.load %arg7[%c0_13, %c0_14] : memref<8x1xf32, #tpu.memory_space<vmem>>, vector<8x1xf32>
    tpu.vector_store %arg7[%c0_13, %c0_14], %27 {strides = array<i32>} : memref<8x1xf32, #tpu.memory_space<vmem>>, vector<8x1xf32>,
    %c0_15 = arith.constant 0 : index
    %c0_16 = arith.constant 0 : index
    %29 = vector.load %arg6[%c0_15, %c0_16] : memref<8x1xf32, #tpu.memory_space<vmem>>, vector<8x1xf32>
    tpu.vector_store %arg6[%c0_15, %c0_16], %17 {strides = array<i32>} : memref<8x1xf32, #tpu.memory_space<vmem>>, vector<8x1xf32>,
    %c0_i32_17 = arith.constant 0 : i32
    %30 = arith.cmpi eq, %arg1, %c0_i32_17 : i32
    %31 = arith.extui %30 : i1 to i32
    %c0_i32_18 = arith.constant 0 : i32
    %32 = arith.cmpi ne, %31, %c0_i32_18 : i32
    scf.if %32 {
      %c0_19 = arith.constant 0 : index
      %c0_20 = arith.constant 0 : index
      %33 = vector.load %arg6[%c0_19, %c0_20] : memref<8x1xf32, #tpu.memory_space<vmem>>, vector<8x1xf32>
      %c0_21 = arith.constant 0 : index
      %c0_22 = arith.constant 0 : index
      %34 = vector.load %arg7[%c0_21, %c0_22] : memref<8x1xf32, #tpu.memory_space<vmem>>, vector<8x1xf32>
      %35 = math.log %34 : vector<8x1xf32>
      %36 = arith.addf %33, %35 : vector<8x1xf32>
      %c0_23 = arith.constant 0 : index
      %c0_24 = arith.constant 0 : index
      %37 = vector.load %arg8[%c0_23, %c0_24] : memref<8x1xf32, #tpu.memory_space<vmem>>, vector<8x1xf32>
      %38 = arith.subf %36, %37 : vector<8x1xf32>
      %39 = vector.shape_cast %38 : vector<8x1xf32> to vector<1x8x1xf32>
      %cst_25 = arith.constant dense<0.000000e+00> : vector<1xf32>
      %40 = vector.multi_reduction <add>, %39, %cst_25 [1, 2] : vector<1x8x1xf32> to vector<1xf32>
      %41 = vector.shape_cast %40 : vector<1xf32> to vector<1x1x1xf32>
      %42 = vector.extract %41[0, 0, 0] : f32 from vector<1x1x1xf32>
      %43 = vector.broadcast %42 : f32 to vector<1x1xf32>
      %44 = vector.shape_cast %43 : vector<1x1xf32> to vector<1x1xf32>
      %45 = vector.broadcast %44 : vector<1x1xf32> to vector<8x128xf32>
      %c0_26 = arith.constant 0 : index
      %c0_27 = arith.constant 0 : index
      %46 = vector.load %arg4[%c0_26, %c0_27] : memref<8x128xf32, #tpu.memory_space<vmem>>, vector<8x128xf32>
      tpu.vector_store %arg4[%c0_26, %c0_27], %45 {strides = array<i32>} : memref<8x128xf32, #tpu.memory_space<vmem>>, vector<8x128xf32>,
    } else {
    }
    return
  }
  func.func @transform_0(%arg0: i32, %arg1: i32) -> (i32, i32) {
    %c0_i32 = arith.constant 0 : i32
    %c0_i32_0 = arith.constant 0 : i32
    return %arg0, %c0_i32 : i32, i32
  }
  func.func @transform_1(%arg0: i32, %arg1: i32) -> (i32, i32) {
    %c0_i32 = arith.constant 0 : i32
    %c0_i32_0 = arith.constant 0 : i32
    return %arg1, %c0_i32 : i32, i32
  }
  func.func @transform_2(%arg0: i32, %arg1: i32) -> (i32, i32) {
    %c0_i32 = arith.constant 0 : i32
    %c0_i32_0 = arith.constant 0 : i32
    return %arg0, %c0_i32 : i32, i32
  }
}

</mosaic_0001>

<bundles_post_ra>
// kernel: tpu_custom_call.1
= control target key start
LH: loop header
LB: loop body
LE: loop exit
PB: predicated region body
PF: predicated region fallthrough
CT: control target
= control target key end

     0   :  { %7 = vsyncpa [#allocation7], 0  ;;  %s382_s0 = inlined_call_operand.hbm [shape: f32[8,32], index: 0, kind: input, shape index: {}]   ;;  %s383_s1 = inlined_call_operand.hbm [shape: f32[8,32], index: 1, kind: input, shape index: {}]   ;;  %s384_s2 = inlined_call_operand.hbm [shape: f32[8,128], index: 2, kind: output, shape index: {}]  }
   0x1   :  { %8 = vsyncpa [#allocation10], 0 }
   0x2   :  { %9 = vsyncpa [#allocation8], 0  ;;  %s314_s9 = smov [#allocation6]   ;;  %s315_s11 = smov [#allocation9]  }
   0x3   :  { %s16_s10 = sshll.u32 %s314_s9, 4  ;;  %s26_s12 = sshll.u32 %s315_s11, 4  ;;  %s17_s10 = int_to_ptr.vmem [resolvable:$true] %s16_s10  ;;  %s27_s12 = int_to_ptr.vmem [resolvable:$true] %s26_s12 }
   0x4   :  { %s242_s15 = scalar_lea.hbm %s382_s0, 128 }
   0x5   :  { %p243_p0 = scmp.ne.s32.totalorder %s382_s0, %s242_s15  ;;  %p246_p1 = scmp.lt.u32.totalorder %s242_s15, %s382_s0 }
   0x7   :  { %p248_p2 = pnand %p246_p1, %p243_p0 }
   0x9   :  { %251 = shalt.err (!%p248_p2)
}
   0xa   :  { %s252_s20 = scalar_lea.vmem %s17_s10, 128  ;;  %p257_p4 = scmp.lt.s32.totalorder %s17_s10, %s17_s10 }
   0xb   :  { %p253_p3 = scmp.ne.s32.totalorder %s17_s10, %s252_s20  ;;  %p258_p5 = scmp.lt.s32.totalorder %s252_s20, %s252_s20 }
   0xd   :  { %p259_p6 = por %p258_p5, %p257_p4 }
   0xf   :  { %p260_p7 = pnand %p259_p6, %p253_p3 }
  0x11   :  { %263 = shalt.err (!%p260_p7)
}
  0x12   :  { %19 = dma.hbm_to_vmem [thread:$0]  %s382_s0, 128, %s17_s10, [#allocation7]  }
  0x13   :  { %s264_s25 = scalar_lea.hbm %s383_s1, 128 }
  0x14   :  { %p265_p8 = scmp.ne.s32.totalorder %s383_s1, %s264_s25  ;;  %p268_p9 = scmp.lt.u32.totalorder %s264_s25, %s383_s1 }
  0x16   :  { %p270_p10 = pnand %p268_p9, %p265_p8 }
  0x18   :  { %273 = shalt.err (!%p270_p10)
}
  0x19   :  { %s274_s30 = scalar_lea.vmem %s27_s12, 128  ;;  %p279_p12 = scmp.lt.s32.totalorder %s27_s12, %s27_s12 }
  0x1a   :  { %p275_p11 = scmp.ne.s32.totalorder %s27_s12, %s274_s30  ;;  %p280_p13 = scmp.lt.s32.totalorder %s274_s30, %s274_s30 }
  0x1c   :  { %p281_p0 = por %p280_p13, %p279_p12 }
  0x1e   :  { %p282_p1 = pnand %p281_p0, %p275_p11 }
  0x20   :  { %285 = shalt.err (!%p282_p1)
}
  0x21   :  { %29 = dma.hbm_to_vmem [thread:$0]  %s383_s1, 128, %s27_s12, [#allocation10]  }
  0x22   :  { %308 = dma.done.wait [#allocation7], 128  }
  0x23   :  { %309 = vsyncadd [#allocation7], 4294967168 }
  0x24   :  { %310 = dma.done.wait [#allocation10], 128  }
  0x25   :  { %311 = vsyncadd [#allocation10], 4294967168  ;;  %vm44_vm0 = vcmask 7168   ;;  %v316_v0 = vmov 0.0   ;;  %vm317_vm1 = vmmov 0   ;;  %v40_v1 = vld [vmem:[#allocation6] sm:$0xff]  ;;  %v134_v17 = vlaneseq }
  0x26   :  { %46 = vst.msk [vmem:[#allocation4] sm:$0xff] %vm44_vm0, %v316_v0  ;;  %47 = vst.msk [vmem:[#allocation5] sm:$0xff] %vm44_vm0, %v316_v0  ;;  %221 = vmatprep.subr.mxu0 %v316_v0  ;;  %223 = vmatprep.mubr.msk.f32.mxu0 %vm317_vm1, %v316_v0  ;;  %vm42_vm2 = vcmask 261120   ;;  %v49_v2 = vld [vmem:[#allocation9] sm:$0xff]  ;;  %v41_v3 = vmul.f32 5.0, %v40_v1  ;;  %v318_v5 = vmov -inf  }
  0x27   :  { %222 = vmatpush3.xpose.msk.msra.mxu0 %vm42_vm2, %v49_v2  ;;  %45 = vst.msk [vmem:[#allocation3] sm:$0xff] %vm44_vm0, %v318_v5  ;;  %vm146_vm3 = vcmask 64512   ;;  %v319_v9 = vmov 0   ;;  %v135_v18 = vshrl.u32 %v134_v17, 7  ;;  %v137_v19 = vand.u32 127, %v134_v17  ;;  %s320_s1 = smov [#allocation11]  }
  0x28   :  { %43 = vst.msk [vmem:[#allocation2] sm:$0xff] %vm42_vm2, %v41_v3  ;;  %235 = vset.pattern.permute.xlu0 %v319_v9  ;;  %s207_s4 = sshll.u32 %s320_s1, 4  ;;  %s208_s4 = int_to_ptr.vmem [resolvable:$true] %s207_s4 }
  0x29   :  { %vm144_vm4 = vcmp.eq.s32.totalorder %v137_v19, %v135_v18  ;;  %s286_s6 = scalar_lea.vmem %s208_s4, 128  ;;  %p291_p3 = scmp.lt.s32.totalorder %s208_s4, %s208_s4 }
  0x2a   :  { %p287_p2 = scmp.ne.s32.totalorder %s208_s4, %s286_s6  ;;  %p292_p4 = scmp.lt.s32.totalorder %s286_s6, %s286_s6 }
  0x2c   :  { %p293_p5 = por %p292_p4, %p291_p3 }
  0x2d   :  { %v170_v26 = vld [vmem:[#allocation4] sm:$0xff]  ;;  %v143_v30 = vld [vmem:[#allocation5] sm:$0xff] }
  0x2e   :  { %v153_v10 = vld [vmem:[#allocation3] sm:$0xff]  ;;  %p294_p6 = pnand %p293_p5, %p287_p2 }
  0x2f   :  { %v48_v4 = vld [vmem:[#allocation2] sm:$0xff] }
  0x30   :  { %224 = vmatmul.mubr.msk.f32.vlgmr.msra.gmra.mrb[0].mxu0 %vm42_vm2, %v48_v4 }
 0x103   :  { %v123_v6 = vpop.f32.mrb[0].mxu0 }
 0x104   :  { %v225_v7 = vpop.f32.mrb[1].mxu0  ;;  %v155_v8 = vsel %vm146_vm3, %v123_v6, -inf  ;;  %v145_v22 = vsel %vm144_vm4, %v123_v6, 0.0 }
 0x105   :  { %156 = vmax.xlane.f32.xlu0 %v155_v8  ;;  %v147_v23 = vsel %vm146_vm3, %v145_v22, 0.0 }
 0x192   :  { %v157_v11 = vpop.xlane.xlu0 %156 }
 0x193   :  { %v158_v12 = vmax.f32 %v153_v10, %v157_v11 }
 0x195   :  { %v159_v13 = vsub.f32 %v153_v10, %v158_v12  ;;  %178 = vst.msk [vmem:[#allocation3] sm:$0xff] %vm44_vm0, %v158_v12  ;;  %164 = vperm.xlu0 %235, %v158_v12  }
 0x197   :  { %v160_v24 = vmul.f32 1.442695, %v159_v13 }
 0x19c   :  { %v182_v36 = vld [vmem:[#allocation3] sm:$0xff] }
 0x214   :  { %v165_v14 = vpop.permute.xlu0 %164 }
 0x215   :  { %v167_v15 = vsub.f32 %v123_v6, %v165_v14 }
 0x217   :  { %v168_v16 = vmul.f32 1.442695, %v167_v15 }
 0x219   :  { %236 = vpow2.f32 %v168_v16 }
 0x21a   :  { %238 = vpow2.f32 %v160_v24 }
 0x223   :  { %v237_v20 = vpop.eup %236 }
 0x224   :  { %v172_v21 = vsel %vm146_vm3, %v237_v20, 0.0  ;;  %v239_v25 = vpop.eup %238 }
 0x225   :  { %173 = vadd.xlane.f32.xlu1 %v172_v21  ;;  %v171_v27 = vmul.f32 %v239_v25, %v170_v26 }
 0x229   :  { %148 = vadd.xlane.f32.xlu1 %v147_v23 }
 0x2b2   :  { %v174_v28 = vpop.xlane.xlu1 %173 }
 0x2b3   :  { %v175_v29 = vadd.f32 %v174_v28, %v171_v27 }
 0x2b5   :  { %177 = vst.msk [vmem:[#allocation4] sm:$0xff] %vm44_vm0, %v175_v29 }
 0x2b6   :  { %v149_v31 = vpop.xlane.xlu1 %148 }
 0x2b7   :  { %v150_v32 = vadd.f32 %v149_v31, %v143_v30 }
 0x2b9   :  { %152 = vst.msk [vmem:[#allocation5] sm:$0xff] %vm44_vm0, %v150_v32 }
 0x2bc   :  { %v183_v33 = vld [vmem:[#allocation4] sm:$0xff] }
 0x2bd   :  { %240 = vlog2.f32 %v183_v33 }
 0x2c0   :  { %v187_v38 = vld [vmem:[#allocation5] sm:$0xff] }
 0x2c7   :  { %v241_v34 = vpop.eup %240 }
 0x2c8   :  { %v185_v35 = vmul.f32 0.6931472, %v241_v34 }
 0x2ca   :  { %v186_v37 = vadd.f32 %v185_v35, %v182_v36 }
 0x2cc   :  { %v188_v39 = vsub.f32 %v186_v37, %v187_v38 }
 0x2ce   :  { %v189_v40 = vsel %vm44_vm0, %v188_v39, 0.0 }
 0x2cf   :  { %190 = vadd.xlane.f32.xlu1 %v189_v40 }
 0x35c   :  { %v191_v41 = vpop.xlane.xlu1 %190 }
 0x35d   :  { %v192_v42 = vrot.slane %v191_v41, 4 }
 0x35f   :  { %v193_v43 = vadd.f32 %v192_v42, %v191_v41 }
 0x361   :  { %v194_v44 = vrot.slane %v193_v43, 2 }
 0x363   :  { %v195_v45 = vadd.f32 %v194_v44, %v193_v43 }
 0x365   :  { %v196_v46 = vrot.slane %v195_v45, 1 }
 0x367   :  { %v197_v47 = vadd.f32 %v196_v46, %v195_v45 }
 0x369   :  { %226 = vpush %v197_v47 }
 0x39a   :  { %s227_s5 = spop %226 }
 0x39b   :  { %v199_v48 = vstv %s227_s5 }
 0x39c   :  { %200 = vst [vmem:[#allocation11] sm:$0xff] %v199_v48 }
 0x39d   :  { %297 = shalt.err (!%p294_p6)
}
 0x39e   :  { %s298_s9 = scalar_lea.hbm %s384_s2, 128 }
 0x39f   :  { %p299_p7 = scmp.ne.s32.totalorder %s384_s2, %s298_s9  ;;  %p302_p8 = scmp.lt.u32.totalorder %s298_s9, %s384_s2 }
 0x3a1   :  { %p304_p9 = pnand %p302_p8, %p299_p7 }
 0x3a3   :  { %307 = shalt.err (!%p304_p9)
}
 0x3a4   :  { %210 = dma.vmem_to_hbm [thread:$0]  %s208_s4, 128, %s384_s2, [#allocation8]  }
 0x3a5   :  { %312 = dma.done.wait [#allocation8], 128  }
 0x3a6   :  { %313 = vsyncadd [#allocation8], 4294967168 }
 0x3a7   :  { %214 = vsyncpa [#allocation7], 1 }
 0x3a8   :  { %215 = vsyncpa [#allocation10], 1 }
 0x3a9   :  { %216 = vsyncpa [#allocation8], 1 }

</bundles_post_ra>
